<compile_context>
chip_gen: v7x
topology: tpu7x:2x2x1
jax: 0.10.0
libtpu: 0.0.40
codegen_flags: <defaults>
</compile_context>

<pallas_src>
import functools

import jax
import jax.numpy as jnp
from jax.experimental import pallas as pl
from jax.experimental.pallas import tpu as pltpu


def _ensemble_kernel(x_ref, w_ref, b_ref, o_ref, *, method, inv_m):
    """One grid step: accumulate model m's prediction for one class tile."""
    m = pl.program_id(1)  # model axis (innermost, reduction)

    @pl.when(m == 0)
    def _():
        o_ref[...] = jnp.zeros_like(o_ref)

    # Per-model prediction for this class tile:
    #   logits = x @ W_m[:, tile] + b_m[tile]   (bf16 operands, f32 accumulate)
    logits = jnp.dot(
        x_ref[...], w_ref[0], preferred_element_type=jnp.float32
    ) + b_ref[0]                                              # (B, tc) f32

    if method == "mean":
        o_ref[...] += logits
    else:  # "probmean": softmax over the (full, untiled) class axis
        mx = jnp.max(logits, axis=-1, keepdims=True)
        e = jnp.exp(logits - mx)
        p = e * pl.reciprocal(jnp.sum(e, axis=-1, keepdims=True), approx=True)
        o_ref[...] += p

    @pl.when(m == pl.num_programs(1) - 1)
    def _():
        if method == "mean":
            # Static compile-time constant 1/M: single VALU multiply.
            o_ref[...] = o_ref[...] * inv_m
        else:
            # The /M cancels in the renormalization; renormalize the raw sum.
            acc = o_ref[...]
            o_ref[...] = acc * pl.reciprocal(
                jnp.sum(acc, axis=-1, keepdims=True), approx=True
            )


def _pick_class_tile(C, method):
    if method == "probmean":
        # Per-model softmax needs the whole class axis in one block.
        # TODO(synk): two-pass / online softmax over C tiles for very large C.
        return C
    for tc in (1024, 512, 256, 128):   # lane-dense (>=128) output tiles
        if C % tc == 0:
            return tc
    return C


def ensemble_forward(x, weights, biases, method="mean"):
    """x: [B, D], weights: [M, D, C], biases: [M, 1, C] -> ensembled [B, C] (f32)."""
    if method not in ("mean", "probmean"):
        # TODO(synk): 'ranking' needs an argsort along the class axis; there is
        # no clean Pallas/TPU sort primitive, so it is not implemented in-kernel.
        raise ValueError(f"Unsupported ensemble method {method!r}")

    B, D = x.shape
    M, D2, C = weights.shape
    assert D2 == D and biases.shape == (M, 1, C)

    # bf16 matmul operands: halves HBM traffic of the dominant W stream and
    # runs at full MXU rate.  Accumulation / softmax stay in f32.
    x_bf = x.astype(jnp.bfloat16)
    w_bf = weights.astype(jnp.bfloat16)
    b_f32 = biases.astype(jnp.float32)

    tc = _pick_class_tile(C, method)
    num_c = C // tc

    kernel = functools.partial(_ensemble_kernel, method=method, inv_m=1.0 / M)

    flops = 2 * B * D * C * M
    transcendentals = B * C * M if method == "probmean" else 0
    bytes_accessed = (M * D * C * 2) + (B * D * 2) + (M * C * 4) + (B * C * 4)

    return pl.pallas_call(
        kernel,
        out_shape=jax.ShapeDtypeStruct((B, C), jnp.float32),
        grid_spec=pltpu.PrefetchScalarGridSpec(
            num_scalar_prefetch=0,
            grid=(num_c, M),  # class tiles (parallel) x models (reduction, innermost)
            in_specs=[
                pl.BlockSpec((B, D), lambda c, m: (0, 0)),         # x (grid-invariant)
                pl.BlockSpec((1, D, tc), lambda c, m: (m, 0, c)),  # W_m class tile
                pl.BlockSpec((1, 1, tc), lambda c, m: (m, 0, c)),  # b_m class tile
            ],
            # Output block index is constant across m -> stays resident in VMEM
            # and serves directly as the f32 accumulator (no scratch, no copy).
            out_specs=pl.BlockSpec((B, tc), lambda c, m: (0, c)),
        ),
        compiler_params=pltpu.CompilerParams(
            dimension_semantics=("parallel", "arbitrary"),
        ),
        cost_estimate=pl.CostEstimate(
            flops=flops,
            transcendentals=transcendentals,
            bytes_accessed=bytes_accessed,
        ),
    )(x_bf, w_bf, b_f32)


def _reference(x, weights, biases, method):
    # Matched-precision reference: bf16 matmul operands, f32 everywhere else.
    preds = jnp.einsum(
        "bd,mdc->mbc",
        x.astype(jnp.bfloat16),
        weights.astype(jnp.bfloat16),
        preferred_element_type=jnp.float32,
    ) + biases.astype(jnp.float32)
    if method == "mean":
        return preds.mean(0)
    p = jax.nn.softmax(preds, axis=-1)
    ens = p.mean(0)
    return ens / ens.sum(-1, keepdims=True)


if __name__ == "__main__":
    # Small, deterministic synthetic setup.
    M = 3       # number of models in the ensemble
    B = 8       # batch
    D = 32      # input features per example
    C = 1024    # number of classes (lane-dense; exercises the C tiling for 'mean')

    key = jax.random.PRNGKey(0)
    kx, kw, kb = jax.random.split(key, 3)
    x = jax.random.normal(kx, (B, D), dtype=jnp.float32)
    weights = 0.1 * jax.random.normal(kw, (M, D, C), dtype=jnp.float32)
    biases = 0.01 * jax.random.normal(kb, (M, 1, C), dtype=jnp.float32)

    for method in ("mean", "probmean"):
        out = jax.block_until_ready(
            ensemble_forward(x, weights, biases, method=method)
        )
        ref = _reference(x, weights, biases, method)
        assert out.shape == (B, C)
        assert jnp.allclose(out, ref, atol=5e-3, rtol=5e-3), (
            f"mismatch for method={method}"
        )

    print("KERNEL_OK")
</pallas_src>

<mosaic_0001>
module attributes {stable_mosaic.version = 11 : i64} {
  func.func @_ensemble_kernel(%arg0: i32, %arg1: i32, %arg2: memref<8x32xbf16, #tpu.memory_space<vmem>>, %arg3: memref<1x32x1024xbf16, #tpu.memory_space<vmem>>, %arg4: memref<1x1x1024xf32, #tpu.memory_space<vmem>>, %arg5: memref<8x1024xf32, #tpu.memory_space<vmem>>) attributes {dimension_semantics = [#tpu.dimension_semantics<parallel>, #tpu.dimension_semantics<arbitrary>], iteration_bounds = array<i64: 1, 3>, scalar_prefetch = 0 : i64, scratch_operands = 0 : i64, tpu.core_type = #tpu.core_type<tc>, window_params = [{pipeline_mode = #tpu.pipeline_mode<synchronous>, transform_indices = @transform_0, window_bounds = array<i64: 8, 32>}, {transform_indices = @transform_1, window_bounds = array<i64: 1, 32, 1024>}, {transform_indices = @transform_2, window_bounds = array<i64: 1, 1, 1024>}, {transform_indices = @transform_3, window_bounds = array<i64: 8, 1024>}]} {
    %c0_i32 = arith.constant 0 : i32
    %0 = arith.cmpi eq, %arg1, %c0_i32 : i32
    %1 = arith.extui %0 : i1 to i32
    %c0_i32_0 = arith.constant 0 : i32
    %2 = arith.cmpi ne, %1, %c0_i32_0 : i32
    scf.if %2 {
      %cst_13 = arith.constant 0.000000e+00 : f32
      %17 = vector.broadcast %cst_13 : f32 to vector<8x1024xf32>
      %c0_14 = arith.constant 0 : index
      %c0_15 = arith.constant 0 : index
      %18 = vector.load %arg5[%c0_14, %c0_15] : memref<8x1024xf32, #tpu.memory_space<vmem>>, vector<8x1024xf32>
      tpu.vector_store %arg5[%c0_14, %c0_15], %17 {strides = array<i32>} : memref<8x1024xf32, #tpu.memory_space<vmem>>, vector<8x1024xf32>,
    } else {
    }
    %c0 = arith.constant 0 : index
    %c0_1 = arith.constant 0 : index
    %3 = vector.load %arg2[%c0, %c0_1] : memref<8x32xbf16, #tpu.memory_space<vmem>>, vector<8x32xbf16>
    %c0_2 = arith.constant 0 : index
    %c0_3 = arith.constant 0 : index
    %c0_4 = arith.constant 0 : index
    %4 = vector.load %arg3[%c0_2, %c0_3, %c0_4] : memref<1x32x1024xbf16, #tpu.memory_space<vmem>>, vector<1x32x1024xbf16>
    %5 = vector.shape_cast %4 : vector<1x32x1024xbf16> to vector<32x1024xbf16>
    %cst = arith.constant dense<0.000000e+00> : vector<8x1024xf32>
    %6 = tpu.matmul %3, %5, %cst {dimension_numbers = #tpu.dot_dimension_numbers<[1], [0], [0], [1], [0, 0, 1, 1], [], []>} : vector<8x32xbf16>, vector<32x1024xbf16>, vector<8x1024xf32> -> vector<8x1024xf32>
    %c0_5 = arith.constant 0 : index
    %c0_6 = arith.constant 0 : index
    %c0_7 = arith.constant 0 : index
    %7 = vector.load %arg4[%c0_5, %c0_6, %c0_7] : memref<1x1x1024xf32, #tpu.memory_space<vmem>>, vector<1x1x1024xf32>
    %8 = vector.shape_cast %7 : vector<1x1x1024xf32> to vector<1x1024xf32>
    %9 = vector.broadcast %8 : vector<1x1024xf32> to vector<8x1024xf32>
    %10 = arith.addf %6, %9 : vector<8x1024xf32>
    %c0_8 = arith.constant 0 : index
    %c0_9 = arith.constant 0 : index
    %11 = vector.load %arg5[%c0_8, %c0_9] : memref<8x1024xf32, #tpu.memory_space<vmem>>, vector<8x1024xf32>
    %12 = arith.addf %11, %10 : vector<8x1024xf32>
    %c0_10 = arith.constant 0 : index
    %c0_11 = arith.constant 0 : index
    %13 = vector.load %arg5[%c0_10, %c0_11] : memref<8x1024xf32, #tpu.memory_space<vmem>>, vector<8x1024xf32>
    tpu.vector_store %arg5[%c0_10, %c0_11], %12 {strides = array<i32>} : memref<8x1024xf32, #tpu.memory_space<vmem>>, vector<8x1024xf32>,
    %c2_i32 = arith.constant 2 : i32
    %14 = arith.cmpi eq, %arg1, %c2_i32 : i32
    %15 = arith.extui %14 : i1 to i32
    %c0_i32_12 = arith.constant 0 : i32
    %16 = arith.cmpi ne, %15, %c0_i32_12 : i32
    scf.if %16 {
      %c0_13 = arith.constant 0 : index
      %c0_14 = arith.constant 0 : index
      %17 = vector.load %arg5[%c0_13, %c0_14] : memref<8x1024xf32, #tpu.memory_space<vmem>>, vector<8x1024xf32>
      %cst_15 = arith.constant 0.333333343 : f32
      %18 = vector.broadcast %cst_15 : f32 to vector<8x1024xf32>
      %19 = arith.mulf %17, %18 : vector<8x1024xf32>
      %c0_16 = arith.constant 0 : index
      %c0_17 = arith.constant 0 : index
      %20 = vector.load %arg5[%c0_16, %c0_17] : memref<8x1024xf32, #tpu.memory_space<vmem>>, vector<8x1024xf32>
      tpu.vector_store %arg5[%c0_16, %c0_17], %19 {strides = array<i32>} : memref<8x1024xf32, #tpu.memory_space<vmem>>, vector<8x1024xf32>,
    } else {
    }
    return
  }
  func.func @transform_0(%arg0: i32, %arg1: i32) -> (i32, i32) {
    %c0_i32 = arith.constant 0 : i32
    %c0_i32_0 = arith.constant 0 : i32
    %c0_i32_1 = arith.constant 0 : i32
    return %c0_i32, %c0_i32_0 : i32, i32
  }
  func.func @transform_1(%arg0: i32, %arg1: i32) -> (i32, i32, i32) {
    %c0_i32 = arith.constant 0 : i32
    %c0_i32_0 = arith.constant 0 : i32
    return %arg1, %c0_i32, %arg0 : i32, i32, i32
  }
  func.func @transform_2(%arg0: i32, %arg1: i32) -> (i32, i32, i32) {
    %c0_i32 = arith.constant 0 : i32
    %c0_i32_0 = arith.constant 0 : i32
    return %arg1, %c0_i32, %arg0 : i32, i32, i32
  }
  func.func @transform_3(%arg0: i32, %arg1: i32) -> (i32, i32) {
    %c0_i32 = arith.constant 0 : i32
    %c0_i32_0 = arith.constant 0 : i32
    return %c0_i32, %arg0 : i32, i32
  }
}

</mosaic_0001>

<bundles_post_ra>
// kernel: tpu_custom_call.1
= control target key start
LH: loop header
LB: loop body
LE: loop exit
PB: predicated region body
PF: predicated region fallthrough
CT: control target
= control target key end

     0   :  { %8 = vsyncpa [#allocation3], 0  ;;  %s1305_s0 = inlined_call_operand.hbm [shape: bf16[8,32], index: 0, kind: input, shape index: {}]   ;;  %s1306_s1 = inlined_call_operand.hbm [shape: bf16[3,32,1024], index: 1, kind: input, shape index: {}]   ;;  %s1307_s2 = inlined_call_operand.hbm [shape: f32[3,1,1024], index: 2, kind: input, shape index: {}]   ;;  %s1308_s3 = inlined_call_operand.hbm [shape: f32[8,1024], index: 3, kind: output, shape index: {}]  }
   0x1   :  { %9 = vsyncpa [#allocation6], 0 }
   0x2   :  { %11 = vsyncpa [#allocation6 + $0x1], 0 }
   0x3   :  { %12 = vsyncpa [#allocation4], 0  ;;  %s1060_s12 = smov 0   ;;  %s1062_s13 = smov 0  }
   0x4   :  { %s1064_s14 = smov 0   ;;  %s1066_s15 = smov 0  }
   0x5   :  { %s1068_s16 = smov 0   ;;  %s1070_s17 = smov 0  }
   0x6 LB: > { %s27_s18 = sadd.s32 1, %s1026_s16  ;;  %s60_s19 = sadd.s32 1, %s1018_s14  ;;  %s1030_s17 = sphi %s1070_s17, %s18_s17   ;;  %s1026_s16 = sphi %s1068_s16, %s1330_s16   ;;  %s1022_s15 = sphi %s1066_s15, %s1329_s15   ;;  %s1018_s14 = sphi %s1064_s14, %s1328_s14   ;;  %s1014_s13 = sphi %s1062_s13, %s1327_s13   ;;  %s1010_s12 = sphi %s1060_s12, %s1326_s12  }
   0x7   : > { %p28_p0 = scmp.ge.s32.totalorder %s27_s18, 3  ;;  %p67_p1 = scmp.ne.s32.totalorder %s1018_s14, %s1014_s13 }
   0x8   : > { %p68_p2 = scmp.eq.s32.totalorder %s1030_s17, 0  ;;  %p800_p4 = scmp.lt.s32.totalorder %s1030_s17, 3 }
   0x9   : > { %s1332_s18 = smov (%p28_p0, %s27_s18), 0  ;;  %s162_s21 = sand.u32 1, %s1030_s17  }
   0xa   : > { %p69_p3 = por %p68_p2, %p67_p1  ;;  %s55_s20 = ssub.s32 %s1026_s16, %s1332_s18 }
   0xb   : > { %p58_p5 = scmp.eq.s32.totalorder %s55_s20, 0  ;;  %s164_s22 = sand.u32 1, %s1018_s14  }
   0xc   : > { %s774_s23 = sshll.u32 %s1026_s16, 11  ;;  %s738_s25 = sshll.u32 %s164_s22, 7 }
   0xd   : > { %s1104_s24 = scalar_select %p58_p5, %s1018_s14, %s60_s19  }
   0xe   : > { %s1111_s28 = scalar_lea.hbm %s1306_s1, %s774_s23  ;;  %p1113_p6 = pnand %p800_p4, %p69_p3 }
   0xf   : > { %s166_s30 = scalar_lea.vmem [#allocation5], %s738_s25  ;;  %s1119_s5 = scalar_lea.sflag [#allocation6], %s162_s21 }
  0x10   : > { %s1315_s29 = scalar_select %p1113_p6, 1, 0 }
  0x11   : > { %s175_s4 = sshll.u32 %s166_s30, 4  ;;  %s858_s6 = scalar_lea.hbm %s1111_s28, 2048  ;;  %s1117_s4 = int_to_ptr.vmem [resolvable:$true] %s175_s4 }
  0x12   : > { %p859_p7 = scmp.ne.s32.totalorder %s1111_s28, %s858_s6  ;;  %p1310_p8 = pneg %p1113_p6 }
  0x13   : > { %s863_s9 = scalar_lea.hbm %s1306_s1, 6144  ;;  %p864_p11 = scmp.lt.u32.totalorder %s1111_s28, %s1306_s1 }
  0x14   : > { %p861_p9 = pnand %p1310_p8, %p859_p7  ;;  %p865_p12 = scmp.lt.u32.totalorder %s863_s9, %s858_s6 }
  0x15   : > { %p867_p0 = scmp.lt.u32.totalorder %s858_s6, %s1111_s28 }
  0x16   : > { %p862_p10 = pneg %p861_p9  ;;  %p866_p13 = por %p865_p12, %p864_p11 }
  0x18   : > { %p868_p1 = por %p867_p0, %p866_p13 }
  0x1a   : > { %p869_p2 = pnand %p868_p1, %p862_p10 }
  0x1c   : > { %872 = shalt.err (!%p869_p2)
}
  0x1d   : > { %s873_s19 = scalar_lea.vmem %s1117_s4, 2048  ;;  %s1032_s20 = smov [#allocation5]  }
  0x1e   : > { %p874_p3 = scmp.ne.s32.totalorder %s1117_s4, %s873_s19  ;;  %s878_s21 = sshll.u32 %s1032_s20, 4  ;;  %s879_s21 = int_to_ptr.vmem [resolvable:$false] %s878_s21 }
  0x1f   : > { %s880_s23 = scalar_lea.vmem %s879_s21, 4096  ;;  %p881_p7 = scmp.lt.s32.totalorder %s1117_s4, %s879_s21 }
  0x20   : > { %p876_p4 = pnand %p874_p3, %p1310_p8  ;;  %p882_p9 = scmp.lt.s32.totalorder %s880_s23, %s873_s19 }
  0x22   : > { %p877_p5 = pneg %p876_p4  ;;  %p883_p11 = por %p882_p9, %p881_p7 }
  0x24   : > { %p884_p12 = pnand %p883_p11, %p877_p5 }
  0x26   : > { %887 = shalt.err (!%p884_p12)
}
  0x27   : > { %s1033_s25 = smov 512   ;;  %s1034_s26 = smov 32  }
  0x28   : > { %795 = dma.hbm_to_vmem [thread:$0]  (!%p1113_p6), %s1111_s28, 2048, %s1117_s4, %s1119_s5, %s1033_s25, %s1033_s25, %s1034_s26  }
  0x29   : > { %s1148_s27 = sadd.s32 4294967295, %s1030_s17   ;;  %p73_p10 = scmp.ne.s32.totalorder %s1014_s13, %s1010_s12 }
  0x2a   : > { %p1309_p13 = scmp.eq.s32.totalorder %s1148_s27, 0  ;;  %p735_p0 = scmp.ge.s32.totalorder %s1030_s17, 1 }
  0x2b   : > { %p138_p1 = scmp.lt.s32.totalorder %s1030_s17, 4  ;;  %s1035_s28 = smov [#allocation2]  }
  0x2c   : > { %p1157_p2 = por %p1309_p13, %p73_p10  ;;  %s151_s4 = sshll.u32 %s1035_s28, 4  ;;  %s152_s4 = int_to_ptr.vmem [resolvable:$true] %s151_s4 }
  0x2d   : > { %p1161_p3 = pnand %p735_p0, %p138_p1  ;;  %s741_s7 = sshll.u32 %s164_s22, 3 }
  0x2e   : > { %s1316_s30 = scalar_select %p1157_p2, 1, 0 }
  0x2f   : > { %s1317_s6 = scalar_select %p1161_p3, 1, 0 }
  0x30   : > { %p788_p4 = pneg %p1161_p3  ;;  %s775_s12 = sshll.u32 %s1026_s16, 7 }
  0x31   : > { %s1179_s11 = scalar_lea.hbm %s1307_s2, %s775_s12  ;;  %s189_s19 = scalar_lea.vmem [#allocation7], %s741_s7 }
  0x32   : > { %p1172_p5 = pnand %p788_p4, %p1309_p13  ;;  %s199_s20 = sshll.u32 %s189_s19, 4  ;;  %s1181_s20 = int_to_ptr.vmem [resolvable:$true] %s199_s20 }
  0x33   : > { %s888_s23 = scalar_lea.hbm %s1305_s0, 64 }
  0x34   : > { %p889_p7 = scmp.ne.s32.totalorder %s1305_s0, %s888_s23  ;;  %p890_p9 = pneg %p1172_p5 }
  0x35   : > { %p895_p10 = scmp.lt.u32.totalorder %s888_s23, %s1305_s0 }
  0x36   : > { %p891_p11 = pnand %p890_p9, %p889_p7 }
  0x38   : > { %p892_p12 = pneg %p891_p11 }
  0x3a   : > { %p897_p0 = pnand %p895_p10, %p892_p12 }
  0x3c   : > { %900 = shalt.err (!%p897_p0)
}
  0x3d   : > { %s901_s7 = scalar_lea.vmem %s152_s4, 64  ;;  %p909_p8 = scmp.lt.s32.totalorder %s152_s4, %s152_s4 }
  0x3e   : > { %p902_p1 = scmp.ne.s32.totalorder %s152_s4, %s901_s7  ;;  %p910_p2 = scmp.lt.s32.totalorder %s901_s7, %s901_s7 }
  0x40   : > { %p904_p4 = pnand %p902_p1, %p890_p9  ;;  %p911_p3 = por %p910_p2, %p909_p8 }
  0x42   : > { %p905_p13 = pneg %p904_p4 }
  0x44   : > { %p912_p6 = pnand %p911_p3, %p905_p13 }
  0x46   : > { %915 = shalt.err (!%p912_p6)
}
  0x47   : > { %791 = dma.hbm_to_vmem [thread:$0]  (!%p1172_p5), %s1305_s0, 64, %s152_s4, [#allocation3]  }
  0x48   : > { %s916_s19 = scalar_lea.hbm %s1179_s11, 128  ;;  %p1319_p9 = scmp.ne.s32.totalorder %s1315_s29, 0 }
  0x49   : > { %p917_p7 = scmp.ne.s32.totalorder %s1179_s11, %s916_s19  ;;  %s921_s23 = scalar_lea.hbm %s1307_s2, 384 }
  0x4a   : > { %p1320_p11 = pneg %p1319_p9  ;;  %p922_p6 = scmp.lt.u32.totalorder %s1179_s11, %s1307_s2 }
  0x4b   : > { %p923_p8 = scmp.lt.u32.totalorder %s921_s23, %s916_s19  ;;  %p925_p2 = scmp.lt.u32.totalorder %s916_s19, %s1179_s11 }
  0x4c   : > { %p919_p12 = pnand %p917_p7, %p1320_p11 }
  0x4d   : > { %p924_p13 = por %p923_p8, %p922_p6 }
  0x4e   : > { %p920_p10 = pneg %p919_p12 }
  0x4f   : > { %p926_p3 = por %p925_p2, %p924_p13 }
  0x51   : > { %p927_p0 = pnand %p926_p3, %p920_p10 }
  0x53   : > { %930 = shalt.err (!%p927_p0)
}
  0x54   : > { %s931_s4 = scalar_lea.vmem %s1181_s20, 128  ;;  %p1321_p1 = pmov %p1320_p11 }
  0x55   : > { %p932_p5 = scmp.ne.s32.totalorder %s1181_s20, %s931_s4  ;;  %s1036_s26 = smov [#allocation7]  }
  0x56   : > { %s936_s28 = sshll.u32 %s1036_s26, 4  ;;  %s937_s28 = int_to_ptr.vmem [resolvable:$false] %s936_s28 }
  0x57   : > { %p934_p4 = pnand %p932_p5, %p1321_p1  ;;  %s938_s9 = scalar_lea.vmem %s937_s28, 256 }
  0x58   : > { %p939_p11 = scmp.lt.s32.totalorder %s1181_s20, %s937_s28  ;;  %p940_p12 = scmp.lt.s32.totalorder %s938_s9, %s931_s4 }
  0x59   : > { %p935_p7 = pneg %p934_p4 }
  0x5a   : > { %p941_p6 = por %p940_p12, %p939_p11 }
  0x5c   : > { %p942_p8 = pnand %p941_p6, %p935_p7 }
  0x5e   : > { %945 = shalt.err (!%p942_p8)
}
  0x5f   : > { %798 = dma.hbm_to_vmem [thread:$0]  (!%p1319_p9), %s1179_s11, 128, %s1181_s20, %s1119_s5  }
  0x60   : > { %p1322_p10 = scmp.ne.s32.totalorder %s1317_s6, 0 }
  0x61   : > { %p1323_p13 = scmp.eq.s32.totalorder (!%p1322_p10), %s1148_s27, 0 }
  0x62   : > { %208 = sbr.rel (%p1322_p10) target bundleno = 393 (0x189), region = 32 }
  0x69   : > { %997 = dma.done.wait (%p1323_p13), [#allocation3], 64   ;;  %p1324_p2 = pmov %p1323_p13 }
  0x6a   : > { %s214_s7 = sand.u32 1, %s1148_s27   ;;  %s216_s12 = sand.u32 1, %s1014_s13  }
  0x6b   : > { %999 = vsyncadd (%p1324_p2), [#allocation3], 4294967232  ;;  %s746_s10 = sshll.u32 %s216_s12, 7  ;;  %s215_s29 = scalar_lea.sflag [#allocation6], %s214_s7 }
  0x6c   : > { %s1231_s19 = scalar_lea.vmem [#allocation5], %s746_s10  ;;  %p1325_p3 = scmp.ne.s32.totalorder %s1316_s30, 0 }
  0x6e   : > { %1001 = dma.done.wait (%p1325_p3), %s215_s29, 2176  }
  0x6f   : > { %1003 = vsyncadd (%p1325_p3), %s215_s29, 4294965120  ;;  %s1237_s5 = sshll.u32 %s216_s12, 3  ;;  %p748_p9 = scmp.ne.s32.totalorder %s1022_s15, 0 }
  0x70   : > { %s227_s6 = scalar_lea.vmem [#allocation7], %s1237_s5  ;;  %v1037_v0 = vmov (!%p748_p9), 0.0  }
  0x71   : > { %257 = sbr.rel (%p748_p9) target bundleno = 120 (0x78), region = 48  ;;  %258 = vst [vmem:[#allocation8] sm:$0xff] (!%p748_p9), %v1037_v0  ;;  %259 = vst [vmem:[#allocation8 + $0x8] sm:$0xff] (!%p748_p9), %v1037_v0 }
  0x72   : > { %260 = vst [vmem:[#allocation8 + $0x10] sm:$0xff] (!%p748_p9), %v1037_v0  ;;  %261 = vst [vmem:[#allocation8 + $0x18] sm:$0xff] (!%p748_p9), %v1037_v0 }
  0x73   : > { %262 = vst [vmem:[#allocation8 + $0x20] sm:$0xff] (!%p748_p9), %v1037_v0  ;;  %263 = vst [vmem:[#allocation8 + $0x28] sm:$0xff] (!%p748_p9), %v1037_v0 }
  0x74   : > { %264 = vst [vmem:[#allocation8 + $0x30] sm:$0xff] (!%p748_p9), %v1037_v0  ;;  %265 = vst [vmem:[#allocation8 + $0x38] sm:$0xff] (!%p748_p9), %v1037_v0 }
  0x78 PF: > { %v267_v1 = vld [vmem:[%s1231_s19] sm:$0xff]  ;;  %v268_v3 = vld [vmem:[%s1231_s19 + $0x8] sm:$0xff]  ;;  %v1038_v9 = vmov 0   ;;  %v269_v16 = vld [vmem:[%s1231_s19 + $0x10] sm:$0xff]  ;;  %vm405_vm0 = vcmask 261120   ;;  %v285_v35 = vlaneseq  ;;  %p769_p0 = scmp.ne.s32.totalorder %s1022_s15, 2 }
  0x79   : > { %v271_v2 = vld [vmem:[%s1231_s19 + $0x20] sm:$0xff]  ;;  %v272_v5 = vld [vmem:[%s1231_s19 + $0x28] sm:$0xff]  ;;  %441 = vmatprep.mubr.bf16.mxu0 %v1038_v9  ;;  %482 = vmatprep.mubr.bf16.mxu1 %v1038_v9  ;;  %v273_v17 = vld [vmem:[%s1231_s19 + $0x30] sm:$0xff] }
  0x7a   : > { %v750_v4 = vcombine.high %v267_v1, %v271_v2  ;;  %v749_v6 = vcombine.low %v267_v1, %v271_v2  ;;  %v275_v7 = vld [vmem:[%s1231_s19 + $0x40] sm:$0xff]  ;;  %v752_v10 = vcombine.high %v268_v3, %v272_v5  ;;  %v751_v11 = vcombine.low %v268_v3, %v272_v5  ;;  %v276_v13 = vld [vmem:[%s1231_s19 + $0x48] sm:$0xff]  ;;  %v270_v18 = vld [vmem:[%s1231_s19 + $0x18] sm:$0xff] }
  0x7b   : > { %v279_v8 = vld [vmem:[%s1231_s19 + $0x60] sm:$0xff]  ;;  %v280_v14 = vld [vmem:[%s1231_s19 + $0x68] sm:$0xff]  ;;  %v274_v20 = vld [vmem:[%s1231_s19 + $0x38] sm:$0xff]  ;;  %v754_v22 = vcombine.high %v269_v16, %v273_v17  ;;  %v753_v29 = vcombine.low %v269_v16, %v273_v17  ;;  %v286_v36 = vshrl.u32 %v285_v35, 7 }
  0x7c   : > { %v758_v12 = vcombine.high %v275_v7, %v279_v8  ;;  %409 = vmatprep.subr.bf16.mxu0 %v750_v4  ;;  %v760_v15 = vcombine.high %v276_v13, %v280_v14  ;;  %450 = vmatprep.subr.bf16.mxu1 %v752_v10  ;;  %v757_v19 = vcombine.low %v275_v7, %v279_v8  ;;  %v277_v24 = vld [vmem:[%s1231_s19 + $0x50] sm:$0xff]  ;;  %v278_v26 = vld [vmem:[%s1231_s19 + $0x58] sm:$0xff]  ;;  %v283_v38 = vld [vmem:[%s227_s6] sm:$0xff] }
  0x7d   : > { %410 = vmatpush1.bf16.msra.mxu0 %v749_v6  ;;  %451 = vmatpush1.bf16.msra.mxu1 %v751_v11  ;;  %v759_v21 = vcombine.low %v276_v13, %v280_v14  ;;  %v756_v23 = vcombine.high %v270_v18, %v274_v20  ;;  %v281_v25 = vld [vmem:[%s1231_s19 + $0x70] sm:$0xff]  ;;  %v282_v27 = vld [vmem:[%s1231_s19 + $0x78] sm:$0xff]  ;;  %v755_v30 = vcombine.low %v270_v18, %v274_v20  ;;  %v287_v37 = vsub.s32 0, %v286_v36  ;;  %v575_v50 = vld [vmem:[#allocation8 + $0x10] sm:$0xff] }
  0x7e   : > { %411 = vmatprep.subr.bf16.mxu0 %v758_v12  ;;  %452 = vmatprep.subr.bf16.mxu1 %v760_v15  ;;  %v266_v28 = vld [vmem:[#allocation2] sm:$0xf]  ;;  %v762_v31 = vcombine.high %v277_v24, %v281_v25  ;;  %v764_v32 = vcombine.high %v278_v26, %v282_v27  ;;  %v761_v33 = vcombine.low %v277_v24, %v281_v25  ;;  %v295_v39 = vsub.s32 2, %v286_v36  ;;  %v573_v47 = vld [vmem:[#allocation8] sm:$0xff]  ;;  %v576_v57 = vld [vmem:[#allocation8 + $0x18] sm:$0xff] }
  0x7f   : > { %v763_v34 = vcombine.low %v278_v26, %v282_v27  ;;  %v291_v40 = vsub.s32 1, %v286_v36  ;;  %v299_v41 = vsub.s32 3, %v286_v36  ;;  %v288_v42 = vrot.slane %v283_v38, %v287_v37  ;;  %v574_v52 = vld [vmem:[#allocation8 + $0x8] sm:$0xff]  ;;  %v577_v11 = vld [vmem:[#allocation8 + $0x20] sm:$0xff]  ;;  %v579_v14 = vld [vmem:[#allocation8 + $0x30] sm:$0xff] }
  0x80   : > { %v296_v43 = vrot.slane %v283_v38, %v295_v39  ;;  %v303_v53 = vsub.s32 4, %v286_v36  ;;  %v311_v59 = vsub.s32 6, %v286_v36  ;;  %v307_v60 = vsub.s32 5, %v286_v36  ;;  %v578_v16 = vld [vmem:[#allocation8 + $0x28] sm:$0xff]  ;;  %v580_v20 = vld [vmem:[#allocation8 + $0x38] sm:$0xff] }
  0x81   : > { %412 = vmatpush1.bf16.msra.mxu0 %v757_v19  ;;  %453 = vmatpush1.bf16.msra.mxu1 %v759_v21  ;;  %v292_v44 = vrot.slane %v283_v38, %v291_v40  ;;  %v300_v45 = vrot.slane %v283_v38, %v299_v41  ;;  %v315_v1 = vsub.s32 7, %v286_v36 }
  0x82   : > { %491 = vmatprep.subr.bf16.mxu0 %v754_v22  ;;  %532 = vmatprep.subr.bf16.mxu1 %v756_v23  ;;  %v304_v6 = vrot.slane %v283_v38, %v303_v53  ;;  %v312_v7 = vrot.slane %v283_v38, %v311_v59  ;;  %v308_v8 = vrot.slane %v283_v38, %v307_v60 }
  0x84   : > { %765 = vmatmul.mubr.msk.bf16.vlgmr.msra.gmra.mrb[0].mxu0 %vm405_vm0, %v266_v28  ;;  %766 = vmatmul.mubr.msk.bf16.vlgmr.msra.gmra.mrb[0].mxu1 %vm405_vm0, %v266_v28 }
  0x85   : > { %492 = vmatpush1.bf16.msra.mxu0 %v753_v29  ;;  %533 = vmatpush1.bf16.msra.mxu1 %v755_v30 }
  0x86   : > { %493 = vmatprep.subr.bf16.mxu0 %v762_v31  ;;  %534 = vmatprep.subr.bf16.mxu1 %v764_v32 }
  0x87   : > { %523 = vmatprep.mubr.bf16.mxu0 %v1038_v9  ;;  %564 = vmatprep.mubr.bf16.mxu1 %v1038_v9  ;;  %v316_v9 = vrot.slane %v283_v38, %v315_v1 }
  0x89   : > { %494 = vmatpush1.bf16.msra.mxu0 %v761_v33  ;;  %535 = vmatpush1.bf16.msra.mxu1 %v763_v34 }
  0x8c   : > { %767 = vmatmul.mubr.msk.bf16.vlgmr.msra.gmra.mrb[4].mxu0 %vm405_vm0, %v266_v28  ;;  %768 = vmatmul.mubr.msk.bf16.vlgmr.msra.gmra.mrb[4].mxu1 %vm405_vm0, %v266_v28 }
 0x157   : > { %v443_v46 = vpop.f32.mrb[0].mxu0  ;;  %v484_v49 = vpop.f32.mrb[0].mxu1 }
 0x158   : > { %v444_v48 = vadd.f32 %v443_v46, %v288_v42  ;;  %v445_v51 = vpop.f32.mrb[1].mxu0  ;;  %v485_v54 = vadd.f32 %v484_v49, %v296_v43  ;;  %v486_v56 = vpop.f32.mrb[1].mxu1 }
 0x159   : > { %v446_v55 = vadd.f32 %v445_v51, %v292_v44  ;;  %v447_v58 = vpop.f32.mrb[2].mxu0  ;;  %v487_v62 = vadd.f32 %v486_v56, %v300_v45  ;;  %v488_v63 = vpop.f32.mrb[2].mxu1 }
 0x15a   : > { %v581_v61 = vadd.f32 %v573_v47, %v444_v48  ;;  %v448_v0 = vpop.f32.mrb[3].mxu0  ;;  %v583_v2 = vadd.f32 %v575_v50, %v485_v54  ;;  %v489_v4 = vpop.f32.mrb[3].mxu1 }
 0x15b   : > { %v582_v3 = vadd.f32 %v574_v52, %v446_v55  ;;  %v584_v5 = vadd.f32 %v576_v57, %v487_v62 }
 0x15c   : > { %589 = vst [vmem:[#allocation8] sm:$0xff] %v581_v61  ;;  %591 = vst [vmem:[#allocation8 + $0x10] sm:$0xff] %v583_v2 }
 0x15d   : > { %590 = vst [vmem:[#allocation8 + $0x8] sm:$0xff] %v582_v3  ;;  %592 = vst [vmem:[#allocation8 + $0x18] sm:$0xff] %v584_v5 }
 0x15f   : > { %v525_v10 = vpop.f32.mrb[4].mxu0  ;;  %v566_v13 = vpop.f32.mrb[4].mxu1  ;;  %600 = sbr.rel (%p769_p0) target bundleno = 368 (0x170), region = 52 }
 0x160   : > { %v526_v12 = vadd.f32 %v525_v10, %v304_v6  ;;  %v527_v15 = vpop.f32.mrb[5].mxu0  ;;  %v567_v17 = vadd.f32 %v566_v13, %v312_v7  ;;  %v568_v19 = vpop.f32.mrb[5].mxu1 }
 0x161   : > { %v528_v18 = vadd.f32 %v527_v15, %v308_v8  ;;  %v529_v21 = vpop.f32.mrb[6].mxu0  ;;  %v569_v23 = vadd.f32 %v568_v19, %v316_v9  ;;  %v570_v24 = vpop.f32.mrb[6].mxu1 }
 0x162   : > { %v585_v22 = vadd.f32 %v577_v11, %v526_v12  ;;  %v530_v25 = vpop.f32.mrb[7].mxu0  ;;  %v587_v26 = vadd.f32 %v579_v14, %v567_v17  ;;  %v571_v28 = vpop.f32.mrb[7].mxu1 }
 0x163   : > { %v586_v27 = vadd.f32 %v578_v16, %v528_v18  ;;  %v588_v29 = vadd.f32 %v580_v20, %v569_v23  ;;  %v601_v30 = vld [vmem:[#allocation8] sm:$0xff] (!%p769_p0)  ;;  %v603_v32 = vld [vmem:[#allocation8 + $0x10] sm:$0xff] (!%p769_p0) }
 0x164   : > { %593 = vst [vmem:[#allocation8 + $0x20] sm:$0xff] %v585_v22  ;;  %595 = vst [vmem:[#allocation8 + $0x30] sm:$0xff] %v587_v26  ;;  %v602_v31 = vld [vmem:[#allocation8 + $0x8] sm:$0xff] (!%p769_p0)  ;;  %v609_v33 = vmul.f32 (!%p769_p0), 0.33333334, %v601_v30  ;;  %v604_v36 = vld [vmem:[#allocation8 + $0x18] sm:$0xff] (!%p769_p0) }
 0x165   : > { %594 = vst [vmem:[#allocation8 + $0x28] sm:$0xff] %v586_v27  ;;  %596 = vst [vmem:[#allocation8 + $0x38] sm:$0xff] %v588_v29  ;;  %v610_v34 = vmul.f32 (!%p769_p0), 0.33333334, %v602_v31  ;;  %v611_v35 = vmul.f32 (!%p769_p0), 0.33333334, %v603_v32 }
 0x166   : > { %617 = vst [vmem:[#allocation8] sm:$0xff] %v609_v33  ;;  %v612_v39 = vmul.f32 0.33333334, %v604_v36 }
 0x167   : > { %618 = vst [vmem:[#allocation8 + $0x8] sm:$0xff] %v610_v34  ;;  %619 = vst [vmem:[#allocation8 + $0x10] sm:$0xff] %v611_v35 }
 0x168   : > { %620 = vst [vmem:[#allocation8 + $0x18] sm:$0xff] %v612_v39 }
 0x16b   : > { %v605_v37 = vld [vmem:[#allocation8 + $0x20] sm:$0xff]  ;;  %v607_v42 = vld [vmem:[#allocation8 + $0x30] sm:$0xff] }
 0x16c   : > { %v606_v38 = vld [vmem:[#allocation8 + $0x28] sm:$0xff]  ;;  %v613_v40 = vmul.f32 0.33333334, %v605_v37  ;;  %v608_v43 = vld [vmem:[#allocation8 + $0x38] sm:$0xff]  ;;  %v615_v44 = vmul.f32 0.33333334, %v607_v42 }
 0x16d   : > { %v614_v41 = vmul.f32 0.33333334, %v606_v38  ;;  %v616_v45 = vmul.f32 0.33333334, %v608_v43 }
 0x16e   : > { %621 = vst [vmem:[#allocation8 + $0x20] sm:$0xff] %v613_v40  ;;  %623 = vst [vmem:[#allocation8 + $0x30] sm:$0xff] %v615_v44 }
 0x16f   : > { %622 = vst [vmem:[#allocation8 + $0x28] sm:$0xff] %v614_v41  ;;  %624 = vst [vmem:[#allocation8 + $0x38] sm:$0xff] %v616_v45 }
 0x170 PF: > { %p802_p5 = scmp.eq.s32.totalorder %s1148_s27, 2  ;;  %s1039_s15 = smov [#allocation8]  }
 0x171   : > { %s635_s30 = sshll.u32 %s1039_s15, 4  ;;  %s636_s30 = int_to_ptr.vmem [resolvable:$true] %s635_s30 }
 0x172   : > { %s946_s11 = scalar_lea.vmem %s636_s30, 1024  ;;  %p953_p11 = scmp.lt.s32.totalorder %s636_s30, %s636_s30 }
 0x173   : > { %p947_p1 = scmp.ne.s32.totalorder %s636_s30, %s946_s11  ;;  %p954_p12 = scmp.lt.s32.totalorder %s946_s11, %s946_s11 }
 0x175   : > { %p948_p4 = pnand %p947_p1, %p802_p5  ;;  %p955_p6 = por %p954_p12, %p953_p11 }
 0x177   : > { %p949_p7 = pneg %p948_p4 }
 0x179   : > { %p956_p8 = pnand %p955_p6, %p949_p7 }
 0x17b   : > { %959 = shalt.err (!%p956_p8)
}
 0x17c   : > { %s960_s21 = scalar_lea.hbm %s1308_s3, 1024 }
 0x17d   : > { %p961_p10 = scmp.ne.s32.totalorder %s1308_s3, %s960_s21  ;;  %p966_p3 = scmp.lt.u32.totalorder %s960_s21, %s1308_s3 }
 0x17f   : > { %p962_p13 = pnand %p961_p10, %p802_p5 }
 0x181   : > { %p963_p2 = pneg %p962_p13 }
 0x183   : > { %p968_p9 = pnand %p966_p3, %p963_p2 }
 0x185   : > { %971 = shalt.err (!%p968_p9)
}
 0x186   : > { %785 = dma.vmem_to_hbm [thread:$0]  (%p802_p5), %s636_s30, 1024, %s1308_s3, [#allocation4]  }
 0x187   : > { %1005 = dma.done.wait (%p802_p5), [#allocation4], 1024  }
 0x188   : > { %1007 = vsyncadd (%p802_p5), [#allocation4], 4294966272 }
 0x189 PF: > { %s18_s17 = sadd.s32 1, %s1030_s17   ;;  %s1326_s12 = smov %s1014_s13 }
 0x18a   : > { %p15_p0 = scmp.ge.s32.totalorder %s18_s17, 5   ;;  %s1327_s13 = smov %s1018_s14 }
 0x18b   : > { %s1328_s14 = smov %s1104_s24  ;;  %s1329_s15 = smov %s1026_s16 }
 0x18c   : > { %s1330_s16 = smov %s1332_s18  ;;  %17 = sbr.rel (!%p15_p0) target bundleno = 6 (0x6), region = 94 }
 0x193   :  { %648 = vsyncpa [#allocation3], 1 }
 0x194   :  { %650 = vsyncpa [#allocation3 + $0x1], 1 }
 0x195   :  { %651 = vsyncpa [#allocation6], 1 }
 0x196   :  { %653 = vsyncpa [#allocation6 + $0x1], 1 }
 0x197   :  { %654 = vsyncpa [#allocation4], 1 }
 0x198   :  { %656 = vsyncpa [#allocation4 + $0x1], 1 }

</bundles_post_ra>
